<compile_context>
chip_gen: v6e
topology: v6e:2x2x1
jax: 0.10.0
libtpu: 0.0.40
codegen_flags: <defaults>
</compile_context>

<pallas_src>
import math

import jax
import jax.numpy as jnp
from jax.experimental import pallas as pl
from jax.experimental.pallas import tpu as pltpu


def _cdiv(a, b):
    return (a + b - 1) // b


def _scale_kernel(x_ref, w_ref, o_ref):
    # x_ref: (tile_rows, col_tile); w_ref: (1, col_tile) — broadcast multiply.
    # Native-dtype compute (weight already cast in the wrapper).
    o_ref[...] = x_ref[...] * w_ref[...]


def _scale_2d(x2d, w2d, *, tile_rows_hint=512):
    """Run the Pallas scale kernel on a (rows, pd) array with a (1, pd) weight."""
    rows, pd = x2d.shape
    itemsize = jnp.dtype(x2d.dtype).itemsize
    # Sublane packing multiple for this dtype: 8 (f32), 16 (bf16), 32 (int8/fp8).
    sub = max(8, 32 // itemsize)
    lane_dense = (pd % 128 == 0)

    # Generation-aware VMEM budgets.
    try:
        vmem_cap = pltpu.get_tpu_info().vmem_capacity_bytes
    except Exception:
        vmem_cap = 64 * 1024 * 1024  # conservative (v7x-sized) fallback
    if vmem_cap >= 128 * 1024 * 1024:   # v5e / v6e: 128 MiB physical VMEM
        budget_bytes = 48 << 20
        vmem_limit = 96 << 20
    else:                               # v7x: 64 MiB physical per TC
        budget_bytes = 24 << 20
        vmem_limit = 48 << 20

    def _row_cap(col_width):
        # in + out, double-buffered, native dtype.
        per_row = col_width * itemsize * 4
        cap = budget_bytes // max(per_row, 1)
        return max(sub, (cap // sub) * sub)

    # Row tile: biggest that fits the budget at full width.
    col_tile = pd
    tile_rows = min(tile_rows_hint, _row_cap(col_tile))
    tile_rows = max(sub, (tile_rows // sub) * sub)
    if rows <= tile_rows:
        tile_rows = rows                # single full-extent row block (layout-legal)
    row_steps = _cdiv(rows, tile_rows)

    # Column split: keep the pipeline (and v7x's two TensorCores) busy when
    # the row grid is short.
    if lane_dense and row_steps < 4 and pd >= 2 * 128:
        want_cols = min(pd // 128, _cdiv(8, row_steps))
        col_tile = max(128, ((pd // want_cols) // 128) * 128)
    col_steps = _cdiv(pd, col_tile)

    grid = (row_steps, col_steps)

    return pl.pallas_call(
        _scale_kernel,
        out_shape=jax.ShapeDtypeStruct((rows, pd), x2d.dtype),
        grid_spec=pltpu.PrefetchScalarGridSpec(
            num_scalar_prefetch=0,
            grid=grid,
            in_specs=[
                pl.BlockSpec((tile_rows, col_tile), lambda i, j: (i, j)),
                # Weight follows the column axis only; with one column it is a
                # constant block index -> stays resident, never re-DMA'd.
                pl.BlockSpec((1, col_tile), lambda i, j: (0, j)),
            ],
            out_specs=pl.BlockSpec((tile_rows, col_tile), lambda i, j: (i, j)),
        ),
        compiler_params=pltpu.CompilerParams(
            dimension_semantics=("parallel", "parallel"),
            vmem_limit_bytes=vmem_limit,
        ),
    )(x2d, w2d)


def learnable_layer_scaling(x, weight, *, tile_rows=512):
    """out = x * weight, with weight broadcast over all leading dims of x."""
    d_model = x.shape[-1]
    orig_shape = x.shape

    total_rows = 1
    for s in orig_shape[:-1]:
        total_rows *= s

    # Native-dtype compute: pre-cast weight once in the wrapper.
    # TODO(synk): if weight is f32 and x is bf16, PyTorch type promotion would
    # produce an f32 output; we keep x.dtype (module intent is a same-dtype scale).
    w = weight.astype(x.dtype).reshape(1, d_model)

    # --- lane-density packing -------------------------------------------------
    # If d_model is lane-sparse (not a multiple of 128), pack k consecutive
    # logical rows into one physical row so the kernel's last dim is a multiple
    # of 128.  Exact for a pure per-channel scale (weight is just tiled k times).
    k = 128 // math.gcd(d_model, 128)

    if k == 1:
        x2d = x.reshape(total_rows, d_model)
        out2d = _scale_2d(x2d, w, tile_rows_hint=tile_rows)
        return out2d.reshape(orig_shape)

    x_flat = x.reshape(total_rows, d_model)
    bulk_rows = (total_rows // k) * k
    parts = []
    if bulk_rows > 0:
        x_bulk = x_flat[:bulk_rows].reshape(bulk_rows // k, d_model * k)
        w_packed = jnp.tile(w, (1, k))
        out_bulk = _scale_2d(x_bulk, w_packed, tile_rows_hint=tile_rows)
        parts.append(out_bulk.reshape(bulk_rows, d_model))
    if bulk_rows < total_rows:
        # Tiny (< k rows) lane-sparse remainder: plain multiply, negligible cost.
        parts.append(x_flat[bulk_rows:] * w)
    out_flat = parts[0] if len(parts) == 1 else jnp.concatenate(parts, axis=0)
    return out_flat.reshape(orig_shape)


if __name__ == "__main__":
    key = jax.random.PRNGKey(0)

    # --- test 1: f32, lane-sparse d_model that packs evenly (batch*seq % k == 0)
    batch, seq, d_model = 2, 8, 32
    x = jax.random.normal(key, (batch, seq, d_model), dtype=jnp.float32)
    weight = 0.5 + jnp.arange(d_model, dtype=jnp.float32) / d_model
    out = learnable_layer_scaling(x, weight)
    jax.block_until_ready(out)
    ref = x * weight.reshape(1, 1, d_model)
    assert jnp.allclose(out, ref, atol=1e-6, rtol=1e-6), "mismatch (f32 packed)"

    # --- test 2: lane-sparse d_model with a ragged remainder row count
    k2 = jax.random.PRNGKey(1)
    b2, s2, d2 = 2, 9, 48   # 18 rows, pack factor 8 -> 16 bulk + 2 remainder rows
    x2 = jax.random.normal(k2, (b2, s2, d2), dtype=jnp.float32)
    w2 = 1.0 + jnp.arange(d2, dtype=jnp.float32) / (2.0 * d2)
    out2 = learnable_layer_scaling(x2, w2)
    jax.block_until_ready(out2)
    ref2 = x2 * w2.reshape(1, 1, d2)
    assert jnp.allclose(out2, ref2, atol=1e-6, rtol=1e-6), "mismatch (ragged pack)"

    # --- test 3: bf16, lane-dense d_model (native-dtype compute path)
    k3 = jax.random.PRNGKey(2)
    b3, s3, d3 = 2, 8, 128
    x3 = jax.random.normal(k3, (b3, s3, d3), dtype=jnp.float32).astype(jnp.bfloat16)
    w3 = (0.75 + jnp.arange(d3, dtype=jnp.float32) / d3).astype(jnp.bfloat16)
    out3 = learnable_layer_scaling(x3, w3)
    jax.block_until_ready(out3)
    ref3 = x3 * w3.reshape(1, 1, d3)
    assert jnp.allclose(out3.astype(jnp.float32), ref3.astype(jnp.float32),
                        atol=1e-2, rtol=1e-2), "mismatch (bf16)"

    print("KERNEL_OK")
</pallas_src>

<mosaic_0001>
module attributes {stable_mosaic.version = 11 : i64} {
  func.func @_scale_kernel(%arg0: i32, %arg1: i32, %arg2: memref<4x128xf32, #tpu.memory_space<vmem>>, %arg3: memref<1x128xf32, #tpu.memory_space<vmem>>, %arg4: memref<4x128xf32, #tpu.memory_space<vmem>>) attributes {dimension_semantics = [#tpu.dimension_semantics<parallel>, #tpu.dimension_semantics<parallel>], iteration_bounds = array<i64: 1, 1>, scalar_prefetch = 0 : i64, scratch_operands = 0 : i64, tpu.core_type = #tpu.core_type<tc>, window_params = [{transform_indices = @transform_0, window_bounds = array<i64: 4, 128>}, {transform_indices = @transform_1, window_bounds = array<i64: 1, 128>}, {transform_indices = @transform_2, window_bounds = array<i64: 4, 128>}]} {
    %c0 = arith.constant 0 : index
    %c0_0 = arith.constant 0 : index
    %0 = vector.load %arg2[%c0, %c0_0] : memref<4x128xf32, #tpu.memory_space<vmem>>, vector<4x128xf32>
    %c0_1 = arith.constant 0 : index
    %c0_2 = arith.constant 0 : index
    %1 = vector.load %arg3[%c0_1, %c0_2] : memref<1x128xf32, #tpu.memory_space<vmem>>, vector<1x128xf32>
    %2 = vector.broadcast %1 : vector<1x128xf32> to vector<4x128xf32>
    %3 = arith.mulf %0, %2 : vector<4x128xf32>
    %c0_3 = arith.constant 0 : index
    %c0_4 = arith.constant 0 : index
    %4 = vector.load %arg4[%c0_3, %c0_4] : memref<4x128xf32, #tpu.memory_space<vmem>>, vector<4x128xf32>
    tpu.vector_store %arg4[%c0_3, %c0_4], %3 {strides = array<i32>} : memref<4x128xf32, #tpu.memory_space<vmem>>, vector<4x128xf32>,
    return
  }
  func.func @transform_0(%arg0: i32, %arg1: i32) -> (i32, i32) {
    %c0_i32 = arith.constant 0 : i32
    return %arg0, %arg1 : i32, i32
  }
  func.func @transform_1(%arg0: i32, %arg1: i32) -> (i32, i32) {
    %c0_i32 = arith.constant 0 : i32
    %c0_i32_0 = arith.constant 0 : i32
    return %c0_i32, %arg1 : i32, i32
  }
  func.func @transform_2(%arg0: i32, %arg1: i32) -> (i32, i32) {
    %c0_i32 = arith.constant 0 : i32
    return %arg0, %arg1 : i32, i32
  }
}

</mosaic_0001>

<bundles_post_ra>
// kernel: tpu_custom_call.1
= control target key start
LH: loop header
LB: loop body
LE: loop exit
PB: predicated region body
PF: predicated region fallthrough
CT: control target
= control target key end

     0   :  { %7 = vsyncpa [#allocation3], 0  ;;  %s122_s0 = inlined_call_operand.hbm [shape: f32[4,128], index: 0, kind: input, shape index: {}]   ;;  %s123_s1 = inlined_call_operand.vmem [shape: f32[1,128], index: 1, kind: input, shape index: {}]   ;;  %s124_s2 = inlined_call_operand.hbm [shape: f32[4,128], index: 2, kind: output, shape index: {}]  }
   0x1   :  { %8 = vsyncpa [#allocation4], 0  ;;  %s96_s9 = smov [#allocation2]  }
   0x2   :  { %s15_s10 = sshll.u32 %s96_s9, 4  ;;  %s16_s10 = int_to_ptr.vmem [resolvable:$true] %s15_s10 }
   0x3   :  { %s60_s11 = scalar_lea.vmem %s16_s10, 64  ;;  %p65_p1 = scmp.lt.s32.totalorder %s16_s10, %s16_s10 }
   0x4   :  { %p61_p0 = scmp.ne.s32.totalorder %s16_s10, %s60_s11  ;;  %p66_p2 = scmp.lt.s32.totalorder %s60_s11, %s60_s11 }
   0x6   :  { %p67_p3 = por %p66_p2, %p65_p1 }
   0x8   :  { %p68_p4 = pnand %p67_p3, %p61_p0 }
   0xa   :  { %71 = shalt.err (!%p68_p4)
}
   0xb   :  { %18 = dma.hbm_to_vmem [thread:$0]  %s122_s0, 64, %s16_s10, [#allocation3]  }
   0xc   :  { %92 = dma.done.wait [#allocation3], 64  }
   0xd   :  { %93 = vsyncadd [#allocation3], 4294967232  ;;  %s97_s14 = smov [#allocation5]   ;;  %v24_v0 = vld [vmem:[#allocation2] sm:$0xf] }
   0xe   :  { %s40_s15 = sshll.u32 %s97_s14, 4  ;;  %v49_v1 = vld [vmem:[%s123_s1] ss:$0 sm:$0xff]  ;;  %s41_s15 = int_to_ptr.vmem [resolvable:$true] %s40_s15 }
   0xf   :  { %v32_v2 = vmul.f32 %v49_v1, %v24_v0  ;;  %s72_s18 = scalar_lea.vmem %s41_s15, 64  ;;  %p77_p6 = scmp.lt.s32.totalorder %s41_s15, %s41_s15 }
  0x10   :  { %p73_p5 = scmp.ne.s32.totalorder %s41_s15, %s72_s18  ;;  %p78_p7 = scmp.lt.s32.totalorder %s72_s18, %s72_s18 }
  0x11   :  { %33 = vst [vmem:[#allocation5] sm:$0xf] %v32_v2 }
  0x12   :  { %p79_p8 = por %p78_p7, %p77_p6 }
  0x14   :  { %p80_p9 = pnand %p79_p8, %p73_p5 }
  0x16   :  { %83 = shalt.err (!%p80_p9)
}
  0x17   :  { %43 = dma.vmem_to_hbm [thread:$0]  %s41_s15, 64, %s124_s2, [#allocation4]  }
  0x18   :  { %94 = dma.done.wait [#allocation4], 64  }
  0x19   :  { %95 = vsyncadd [#allocation4], 4294967232 }
  0x1a   :  { %47 = vsyncpa [#allocation3], 1 }
  0x1b   :  { %48 = vsyncpa [#allocation4], 1 }

</bundles_post_ra>
